<compile_context>
chip_gen: v5e
topology: v5e:2x2
jax: 0.10.0
libtpu: 0.0.40
codegen_flags: <defaults>
</compile_context>

<pallas_src>
import jax
import jax.numpy as jnp
from jax.experimental import pallas as pl
from jax.experimental.pallas import tpu as pltpu


def _round_up(x, m):
    return ((x + m - 1) // m) * m


def make_fusion_kernel(n_mod, compute_dtype):
    """Kernel: out = relu(sum_m x_m @ W_comb_m + b_comb) for one batch tile."""
    def kernel(*refs):
        x_refs = refs[:n_mod]
        w_refs = refs[n_mod:2 * n_mod]
        b_ref = refs[2 * n_mod]
        out_ref = refs[2 * n_mod + 1]

        # Accumulate the per-modality matmuls in f32 on the MXU.  Inputs are
        # loaded as f32 and cast to the compute dtype in-register (no HBM
        # cast pre-pass); weights arrive already in compute dtype.
        acc = jnp.dot(x_refs[0][...].astype(compute_dtype), w_refs[0][...],
                      preferred_element_type=jnp.float32)
        for m in range(1, n_mod):
            acc = acc + jnp.dot(x_refs[m][...].astype(compute_dtype), w_refs[m][...],
                                preferred_element_type=jnp.float32)

        acc = acc + b_ref[...]                        # f32 bias add (VPU)
        out_ref[...] = jnp.maximum(acc, 0.0).astype(out_ref.dtype)
    return kernel


def prepare_fused_params(params, config, modality_order,
                         compute_dtype=jnp.bfloat16):
    """Fold the two affine layers once per parameter set (f32 pre-multiply).

    `modality_order` must be the order in which modalities appear in the
    inputs dict at forward time (this is what the PyTorch forward uses).
    """
    input_dims = config["input_dims"]
    fusion_dim = config["fusion_dim"]
    min_mod = config.get("min_modalities", 2)
    max_mod = config.get("max_modalities", 3)

    order = [m for m in modality_order if m in input_dims][:max_mod]
    n_present = len(order)
    # Missing-modality slots are ZERO ACTIVATIONS appended at the END (as in
    # the PyTorch forward), so they contribute nothing; only the leading
    # n_present*F rows of the selected fusion weight are needed.
    n_slots = max(n_present, min_mod)

    w_fuse = params[f"w_fuse_{n_slots}"].astype(jnp.float32)   # [F*n_slots, F]
    b_fuse = params[f"b_fuse_{n_slots}"].astype(jnp.float32)   # [1, F]

    w_comb = []
    b_comb = b_fuse
    for j, m in enumerate(order):
        wf = w_fuse[j * fusion_dim:(j + 1) * fusion_dim]        # [F, F]
        w_comb.append((params[f"w_{m}"].astype(jnp.float32) @ wf)
                      .astype(compute_dtype))                   # [d_m, F]
        b_comb = b_comb + params[f"b_{m}"].astype(jnp.float32) @ wf

    return {
        "order": order,
        "w_comb": w_comb,          # list of [d_m, F] in compute_dtype
        "b_comb": b_comb,          # [1, F] f32
        "compute_dtype": compute_dtype,
        "fusion_dim": fusion_dim,
    }


def neural_fusion_forward(inputs, prepared, *, batch_tile=1024,
                          out_dtype=jnp.float32):
    """inputs: dict of [B, d_m] f32 arrays. prepared: from prepare_fused_params."""
    order = prepared["order"]
    w_comb = prepared["w_comb"]
    b_comb = prepared["b_comb"]
    F = prepared["fusion_dim"]
    n_mod = len(order)

    B = inputs[order[0]].shape[0]
    b8 = _round_up(B, 8)
    # Big tiles amortize the ~0.35us per-grid-step overhead (mem-bound kernel);
    # cap so large batches still produce >=2 grid steps for v7x megacore.
    tb = min(batch_tile, b8, max(512, _round_up(max(b8 // 4, 1), 8)))
    B_pad = _round_up(B, tb)

    xs = []
    for m in order:
        x = inputs[m]
        if B_pad != B:
            x = jnp.pad(x, ((0, B_pad - B), (0, 0)))
        xs.append(x)

    grid = (B_pad // tb,)

    in_specs = (
        # Batch-tiled raw modality inputs (last dim equals the full array dim,
        # so no 128-padding of K is needed — keeps x traffic minimal).
        [pl.BlockSpec((tb, x.shape[1]), lambda i: (i, 0)) for x in xs]
        # Folded per-modality weights: VMEM-resident across the whole grid.
        + [pl.BlockSpec(w.shape, lambda i: (0, 0)) for w in w_comb]
        # Folded bias: resident.
        + [pl.BlockSpec((1, F), lambda i: (0, 0))]
    )

    flops = 2 * B_pad * sum(x.shape[1] for x in xs) * F
    bytes_accessed = (
        sum(x.size * x.dtype.itemsize for x in xs)
        + sum(w.size * w.dtype.itemsize for w in w_comb)
        + b_comb.size * 4
        + B_pad * F * jnp.dtype(out_dtype).itemsize
    )

    out = pl.pallas_call(
        make_fusion_kernel(n_mod, prepared["compute_dtype"]),
        out_shape=jax.ShapeDtypeStruct((B_pad, F), out_dtype),
        grid_spec=pltpu.PrefetchScalarGridSpec(
            num_scalar_prefetch=0,
            grid=grid,
            in_specs=in_specs,
            out_specs=pl.BlockSpec((tb, F), lambda i: (i, 0)),
        ),
        compiler_params=pltpu.CompilerParams(
            dimension_semantics=("parallel",)),
        cost_estimate=pl.CostEstimate(flops=flops, transcendentals=0,
                                      bytes_accessed=bytes_accessed),
    )(*xs, *w_comb, b_comb)

    return out[:B] if B_pad != B else out


def make_params(key, config):
    """Deterministic synthetic parameter init (nn.Linear shapes, pre-transposed)."""
    input_dims = config["input_dims"]
    fusion_dim = config["fusion_dim"]
    min_mod = config.get("min_modalities", 2)
    max_mod = config.get("max_modalities", 3)
    params = {}
    keys = jax.random.split(key, 2 * len(input_dims) + 2 * (max_mod - min_mod + 1))
    i = 0
    for m, d in input_dims.items():
        params[f"w_{m}"] = jax.random.normal(keys[i], (d, fusion_dim), jnp.float32) * 0.05
        params[f"b_{m}"] = jax.random.normal(keys[i + 1], (1, fusion_dim), jnp.float32) * 0.05
        i += 2
    for n in range(min_mod, max_mod + 1):
        params[f"w_fuse_{n}"] = jax.random.normal(
            keys[i], (fusion_dim * n, fusion_dim), jnp.float32) * 0.05
        params[f"b_fuse_{n}"] = jax.random.normal(
            keys[i + 1], (1, fusion_dim), jnp.float32) * 0.05
        i += 2
    return params


def reference_forward(inputs, params, config):
    """Pure-JAX reference mirroring the PyTorch forward exactly."""
    input_dims = config["input_dims"]
    min_mod = config.get("min_modalities", 2)
    max_mod = config.get("max_modalities", 3)
    hs = [inputs[m] @ params[f"w_{m}"] + params[f"b_{m}"]
          for m in inputs if m in input_dims]
    if len(hs) < min_mod:
        hs += [jnp.zeros_like(hs[0]) for _ in range(min_mod - len(hs))]
    elif len(hs) > max_mod:
        hs = hs[:max_mod]
    cat = jnp.concatenate(hs, axis=-1)
    n = len(hs)
    return jnp.maximum(cat @ params[f"w_fuse_{n}"] + params[f"b_fuse_{n}"], 0.0)


if __name__ == "__main__":
    config = {
        "input_dims": {"camera": 64, "lidar": 32, "radar": 16},
        "fusion_dim": 128,
        "min_modalities": 2,
        "max_modalities": 3,
    }
    B = 8

    key = jax.random.PRNGKey(0)
    k_in, k_par = jax.random.split(key)
    ks = jax.random.split(k_in, 3)
    inputs = {
        "camera": jax.random.normal(ks[0], (B, 64), jnp.float32),
        "lidar":  jax.random.normal(ks[1], (B, 32), jnp.float32),
        "radar":  jax.random.normal(ks[2], (B, 16), jnp.float32),
    }
    params = make_params(k_par, config)
    ref = reference_forward(inputs, params, config)

    # Modality order must match the order the forward (PyTorch: inputs dict
    # iteration order) will see, so hidden slots line up with W_fuse rows.
    modality_order = list(inputs.keys())

    # Exact-precision path (f32 fold + f32 MXU compute).
    prep_f32 = prepare_fused_params(params, config, modality_order,
                                    compute_dtype=jnp.float32)
    out_f32 = jax.block_until_ready(neural_fusion_forward(inputs, prep_f32))
    assert out_f32.shape == (B, config["fusion_dim"])
    assert jnp.allclose(out_f32, ref, atol=1e-4, rtol=1e-4)

    # bf16 MXU fast path (fold done in f32, then cast; f32 accumulate/epilogue).
    prep_bf16 = prepare_fused_params(params, config, modality_order,
                                     compute_dtype=jnp.bfloat16)
    out_bf16 = jax.block_until_ready(neural_fusion_forward(inputs, prep_bf16))
    assert out_bf16.shape == (B, config["fusion_dim"])
    assert jnp.allclose(out_bf16, ref, atol=3e-2, rtol=3e-2)

    print("KERNEL_OK")
</pallas_src>

<mosaic_0001>
module attributes {stable_mosaic.version = 11 : i64} {
  func.func @kernel(%arg0: i32, %arg1: memref<8x64xf32, #tpu.memory_space<vmem>>, %arg2: memref<8x32xf32, #tpu.memory_space<vmem>>, %arg3: memref<8x16xf32, #tpu.memory_space<vmem>>, %arg4: memref<64x128xf32, #tpu.memory_space<vmem>>, %arg5: memref<32x128xf32, #tpu.memory_space<vmem>>, %arg6: memref<16x128xf32, #tpu.memory_space<vmem>>, %arg7: memref<1x128xf32, #tpu.memory_space<vmem>>, %arg8: memref<8x128xf32, #tpu.memory_space<vmem>>) attributes {dimension_semantics = [#tpu.dimension_semantics<parallel>], iteration_bounds = array<i64: 1>, scalar_prefetch = 0 : i64, scratch_operands = 0 : i64, tpu.core_type = #tpu.core_type<tc>, window_params = [{transform_indices = @transform_0, window_bounds = array<i64: 8, 64>}, {transform_indices = @transform_1, window_bounds = array<i64: 8, 32>}, {transform_indices = @transform_2, window_bounds = array<i64: 8, 16>}, {pipeline_mode = #tpu.pipeline_mode<synchronous>, transform_indices = @transform_3, window_bounds = array<i64: 64, 128>}, {pipeline_mode = #tpu.pipeline_mode<synchronous>, transform_indices = @transform_4, window_bounds = array<i64: 32, 128>}, {pipeline_mode = #tpu.pipeline_mode<synchronous>, transform_indices = @transform_5, window_bounds = array<i64: 16, 128>}, {pipeline_mode = #tpu.pipeline_mode<synchronous>, transform_indices = @transform_6, window_bounds = array<i64: 1, 128>}, {transform_indices = @transform_7, window_bounds = array<i64: 8, 128>}]} {
    %c0 = arith.constant 0 : index
    %c0_0 = arith.constant 0 : index
    %0 = vector.load %arg1[%c0, %c0_0] : memref<8x64xf32, #tpu.memory_space<vmem>>, vector<8x64xf32>
    %c0_1 = arith.constant 0 : index
    %c0_2 = arith.constant 0 : index
    %1 = vector.load %arg4[%c0_1, %c0_2] : memref<64x128xf32, #tpu.memory_space<vmem>>, vector<64x128xf32>
    %cst = arith.constant dense<0.000000e+00> : vector<8x128xf32>
    %2 = tpu.matmul %0, %1, %cst {dimension_numbers = #tpu.dot_dimension_numbers<[1], [0], [0], [1], [0, 0, 1, 1], [], []>} : vector<8x64xf32>, vector<64x128xf32>, vector<8x128xf32> -> vector<8x128xf32>
    %c0_3 = arith.constant 0 : index
    %c0_4 = arith.constant 0 : index
    %3 = vector.load %arg2[%c0_3, %c0_4] : memref<8x32xf32, #tpu.memory_space<vmem>>, vector<8x32xf32>
    %c0_5 = arith.constant 0 : index
    %c0_6 = arith.constant 0 : index
    %4 = vector.load %arg5[%c0_5, %c0_6] : memref<32x128xf32, #tpu.memory_space<vmem>>, vector<32x128xf32>
    %cst_7 = arith.constant dense<0.000000e+00> : vector<8x128xf32>
    %5 = tpu.matmul %3, %4, %cst_7 {dimension_numbers = #tpu.dot_dimension_numbers<[1], [0], [0], [1], [0, 0, 1, 1], [], []>} : vector<8x32xf32>, vector<32x128xf32>, vector<8x128xf32> -> vector<8x128xf32>
    %6 = arith.addf %2, %5 : vector<8x128xf32>
    %c0_8 = arith.constant 0 : index
    %c0_9 = arith.constant 0 : index
    %7 = vector.load %arg3[%c0_8, %c0_9] : memref<8x16xf32, #tpu.memory_space<vmem>>, vector<8x16xf32>
    %c0_10 = arith.constant 0 : index
    %c0_11 = arith.constant 0 : index
    %8 = vector.load %arg6[%c0_10, %c0_11] : memref<16x128xf32, #tpu.memory_space<vmem>>, vector<16x128xf32>
    %cst_12 = arith.constant dense<0.000000e+00> : vector<8x128xf32>
    %9 = tpu.matmul %7, %8, %cst_12 {dimension_numbers = #tpu.dot_dimension_numbers<[1], [0], [0], [1], [0, 0, 1, 1], [], []>} : vector<8x16xf32>, vector<16x128xf32>, vector<8x128xf32> -> vector<8x128xf32>
    %10 = arith.addf %6, %9 : vector<8x128xf32>
    %c0_13 = arith.constant 0 : index
    %c0_14 = arith.constant 0 : index
    %11 = vector.load %arg7[%c0_13, %c0_14] : memref<1x128xf32, #tpu.memory_space<vmem>>, vector<1x128xf32>
    %12 = vector.broadcast %11 : vector<1x128xf32> to vector<8x128xf32>
    %13 = arith.addf %10, %12 : vector<8x128xf32>
    %cst_15 = arith.constant 0.000000e+00 : f32
    %14 = vector.broadcast %cst_15 : f32 to vector<8x128xf32>
    %15 = arith.maximumf %13, %14 : vector<8x128xf32>
    %c0_16 = arith.constant 0 : index
    %c0_17 = arith.constant 0 : index
    %16 = vector.load %arg8[%c0_16, %c0_17] : memref<8x128xf32, #tpu.memory_space<vmem>>, vector<8x128xf32>
    tpu.vector_store %arg8[%c0_16, %c0_17], %15 {strides = array<i32>} : memref<8x128xf32, #tpu.memory_space<vmem>>, vector<8x128xf32>,
    return
  }
  func.func @transform_0(%arg0: i32) -> (i32, i32) {
    %c0_i32 = arith.constant 0 : i32
    %c0_i32_0 = arith.constant 0 : i32
    return %arg0, %c0_i32 : i32, i32
  }
  func.func @transform_1(%arg0: i32) -> (i32, i32) {
    %c0_i32 = arith.constant 0 : i32
    %c0_i32_0 = arith.constant 0 : i32
    return %arg0, %c0_i32 : i32, i32
  }
  func.func @transform_2(%arg0: i32) -> (i32, i32) {
    %c0_i32 = arith.constant 0 : i32
    %c0_i32_0 = arith.constant 0 : i32
    return %arg0, %c0_i32 : i32, i32
  }
  func.func @transform_3(%arg0: i32) -> (i32, i32) {
    %c0_i32 = arith.constant 0 : i32
    %c0_i32_0 = arith.constant 0 : i32
    %c0_i32_1 = arith.constant 0 : i32
    return %c0_i32, %c0_i32_0 : i32, i32
  }
  func.func @transform_4(%arg0: i32) -> (i32, i32) {
    %c0_i32 = arith.constant 0 : i32
    %c0_i32_0 = arith.constant 0 : i32
    %c0_i32_1 = arith.constant 0 : i32
    return %c0_i32, %c0_i32_0 : i32, i32
  }
  func.func @transform_5(%arg0: i32) -> (i32, i32) {
    %c0_i32 = arith.constant 0 : i32
    %c0_i32_0 = arith.constant 0 : i32
    %c0_i32_1 = arith.constant 0 : i32
    return %c0_i32, %c0_i32_0 : i32, i32
  }
  func.func @transform_6(%arg0: i32) -> (i32, i32) {
    %c0_i32 = arith.constant 0 : i32
    %c0_i32_0 = arith.constant 0 : i32
    %c0_i32_1 = arith.constant 0 : i32
    return %c0_i32, %c0_i32_0 : i32, i32
  }
  func.func @transform_7(%arg0: i32) -> (i32, i32) {
    %c0_i32 = arith.constant 0 : i32
    %c0_i32_0 = arith.constant 0 : i32
    return %arg0, %c0_i32 : i32, i32
  }
}

</mosaic_0001>

<bundles_post_ra>
// kernel: tpu_custom_call.1
= control target key start
LH: loop header
LB: loop body
LE: loop exit
PB: predicated region body
PF: predicated region fallthrough
CT: control target
= control target key end

     0   :  { %12 = vsyncpa [#allocation3], 0  ;;  %s496_s0 = inlined_call_operand.hbm [shape: f32[8,64], index: 0, kind: input, shape index: {}]   ;;  %s497_s1 = inlined_call_operand.hbm [shape: f32[8,32], index: 1, kind: input, shape index: {}]   ;;  %s498_s2 = inlined_call_operand.hbm [shape: f32[8,16], index: 2, kind: input, shape index: {}]   ;;  %s499_s3 = inlined_call_operand.hbm [shape: f32[64,128], index: 3, kind: input, shape index: {}]   ;;  %s500_s4 = inlined_call_operand.hbm [shape: f32[32,128], index: 4, kind: input, shape index: {}]   ;;  %s501_s5 = inlined_call_operand.hbm [shape: f32[16,128], index: 5, kind: input, shape index: {}]   ;;  %s502_s6 = inlined_call_operand.vmem [shape: f32[1,128], index: 6, kind: input, shape index: {}]   ;;  %s503_s7 = inlined_call_operand.hbm [shape: f32[8,128], index: 7, kind: output, shape index: {}]  }
   0x1   :  { %13 = vsyncpa [#allocation6], 0 }
   0x2   :  { %14 = vsyncpa [#allocation9], 0 }
   0x3   :  { %15 = vsyncpa [#allocation12], 0  ;;  %s33_s26 = sshll.u32 %s497_s1, 4  ;;  %s34_s26 = int_to_ptr.hbm [resolvable:$true] %s33_s26 }
   0x4   :  { %16 = vsyncpa [#allocation4], 0  ;;  %s423_s27 = smov [#allocation5]   ;;  %s54_s8 = sshll.u32 %s499_s3, 4  ;;  %s55_s8 = int_to_ptr.hbm [resolvable:$true] %s54_s8 }
   0x5   :  { %s35_s28 = sshll.u32 %s423_s27, 4  ;;  %s424_s9 = smov [#allocation8]   ;;  %s36_s28 = int_to_ptr.vmem [resolvable:$true] %s35_s28 }
   0x6   :  { %38 = dma.hbm_to_vmem [thread:$0]  %s34_s26, 128, %s36_s28, [#allocation6]  }
   0x7   :  { %s56_s10 = sshll.u32 %s424_s9, 4  ;;  %s425_s11 = smov 128   ;;  %s57_s10 = int_to_ptr.vmem [resolvable:$true] %s56_s10 }
   0x8   :  { %s426_s12 = smov 8   ;;  %s22_s1 = sshll.u32 %s496_s0, 4  ;;  %s23_s1 = int_to_ptr.hbm [resolvable:$true] %s22_s1 }
   0x9   :  { %62 = dma.hbm_to_vmem [thread:$0]  %s55_s8, 1024, %s57_s10, [#allocation9], %s425_s11, %s425_s11, %s426_s12  }
   0xa   :  { %s427_s15 = smov [#allocation2]   ;;  %s44_s3 = sshll.u32 %s498_s2, 4  ;;  %s45_s3 = int_to_ptr.hbm [resolvable:$true] %s44_s3 }
   0xb   :  { %s24_s16 = sshll.u32 %s427_s15, 4  ;;  %s428_s19 = smov [#allocation7]   ;;  %s25_s16 = int_to_ptr.vmem [resolvable:$true] %s24_s16 }
   0xc   :  { %27 = dma.hbm_to_vmem [thread:$0]  %s23_s1, 128, %s25_s16, [#allocation3]  }
   0xd   :  { %s46_s20 = sshll.u32 %s428_s19, 4  ;;  %s67_s23 = sshll.u32 %s500_s4, 4  ;;  %s47_s20 = int_to_ptr.vmem [resolvable:$true] %s46_s20  ;;  %s68_s23 = int_to_ptr.hbm [resolvable:$true] %s67_s23 }
   0xe   :  { %49 = dma.hbm_to_vmem [thread:$0]  %s45_s3, 128, %s47_s20, [#allocation6]  }
   0xf   :  { %s80_s25 = sshll.u32 %s501_s5, 4  ;;  %s429_s26 = smov [#allocation10]   ;;  %s81_s25 = int_to_ptr.hbm [resolvable:$true] %s80_s25 }
  0x10   :  { %s69_s27 = sshll.u32 %s429_s26, 4  ;;  %s430_s2 = smov [#allocation11]   ;;  %s70_s27 = int_to_ptr.vmem [resolvable:$true] %s69_s27 }
  0x11   :  { %75 = dma.hbm_to_vmem [thread:$0]  %s68_s23, 512, %s70_s27, [#allocation9], %s425_s11, %s425_s11, %s426_s12  }
  0x12   :  { %s82_s28 = sshll.u32 %s430_s2, 4  ;;  %s83_s28 = int_to_ptr.vmem [resolvable:$true] %s82_s28 }
  0x13   :  { %88 = dma.hbm_to_vmem [thread:$0]  %s81_s25, 256, %s83_s28, [#allocation12], %s425_s11, %s425_s11, %s426_s12  }
  0x14   :  { %413 = dma.done.wait [#allocation3], 128  }
  0x15   :  { %414 = vsyncadd [#allocation3], 4294967168 }
  0x16   :  { %415 = dma.done.wait [#allocation6], 256  }
  0x17   :  { %416 = vsyncadd [#allocation6], 4294967040 }
  0x18   :  { %417 = dma.done.wait [#allocation9], 1536  }
  0x19   :  { %418 = vsyncadd [#allocation9], 4294965760 }
  0x1a   :  { %419 = dma.done.wait [#allocation12], 256  }
  0x1b   :  { %420 = vsyncadd [#allocation12], 4294967040  ;;  %v123_v0 = vld [vmem:[#allocation8 + $0x38] sm:$0xff]  ;;  %v122_v1 = vld [vmem:[#allocation8 + $0x30] sm:$0xff]  ;;  %vm180_vm0 = vcmask 130048   ;;  %vm129_vm1 = vcmask 261120  }
  0x1c   :  { %165 = vmatpush.msra.mxu1 %v123_v0  ;;  %v128_v2 = vld [vmem:[#allocation10 + $0x18] sm:$0xff]  ;;  %v121_v3 = vld [vmem:[#allocation8 + $0x28] sm:$0xff]  ;;  %v127_v5 = vld [vmem:[#allocation10 + $0x10] sm:$0xff]  ;;  %vm153_vm2 = vcmask 523264   ;;  %s431_s29 = smov [#allocation13]   ;;  %s219_s10 = sshll.u32 %s503_s7, 4  ;;  %s220_s10 = int_to_ptr.hbm [resolvable:$true] %s219_s10 }
  0x1d   :  { %145 = vmatpush.msra.mxu0 %v128_v2  ;;  %v179_v4 = vld [vmem:[#allocation11 + $0x8] sm:$0xff]  ;;  %v178_v6 = vld [vmem:[#allocation11] sm:$0xff]  ;;  %v177_v7 = vld [vmem:[#allocation7] sm:$0xff]  ;;  %s217_s30 = sshll.u32 %s431_s29, 4  ;;  %s218_s30 = int_to_ptr.vmem [resolvable:$true] %s217_s30 }
  0x1e   :  { %166 = vmatpush.msra.mxu1 %v122_v1  ;;  %198 = vmatpush.msra.mxu2 %v179_v4  ;;  %v126_v8 = vld [vmem:[#allocation10 + $0x8] sm:$0xff]  ;;  %v120_v9 = vld [vmem:[#allocation8 + $0x20] sm:$0xff]  ;;  %v119_v11 = vld [vmem:[#allocation8 + $0x18] sm:$0xff] }
  0x1f   :  { %146 = vmatpush.msra.mxu0 %v127_v5  ;;  %v125_v10 = vld [vmem:[#allocation10] sm:$0xff]  ;;  %v124_v12 = vld [vmem:[#allocation5] sm:$0xff]  ;;  %v117_v14 = vld [vmem:[#allocation8 + $0x8] sm:$0xff] }
  0x20   :  { %167 = vmatpush.msra.mxu1 %v121_v3  ;;  %199 = vmatpush.msra.mxu2 %v178_v6  ;;  %v118_v13 = vld [vmem:[#allocation8 + $0x10] sm:$0xff]  ;;  %v116_v15 = vld [vmem:[#allocation8] sm:$0xff]  ;;  %v115_v16 = vld [vmem:[#allocation2] sm:$0xff] }
  0x21   :  { %234 = vmatmul.msk.f32.vlgmr.msra.gmra.mxu2 %vm180_vm0, %v177_v7  ;;  %147 = vmatpush.msra.mxu0 %v126_v8  ;;  %v244_v21 = vld [vmem:[%s502_s6] ss:$0 sm:$0xff] }
  0x22   :  { %168 = vmatpush.msra.mxu1 %v120_v9 }
  0x23   :  { %148 = vmatpush.msra.mxu0 %v125_v10 }
  0x24   :  { %169 = vmatpush.msra.mxu1 %v119_v11  ;;  %232 = vmatmul.msk.f32.vlgmr.msra.gmra.mxu0 %vm129_vm1, %v124_v12 }
  0x26   :  { %170 = vmatpush.msra.mxu1 %v118_v13 }
  0x28   :  { %171 = vmatpush.msra.mxu1 %v117_v14 }
  0x2a   :  { %172 = vmatpush.msra.mxu1 %v116_v15 }
  0x2b   :  { %233 = vmatmul.msk.f32.vlgmr.msra.gmra.mxu1 %vm153_vm2, %v115_v16 }
  0xa1   :  { %v150_v17 = vpop.f32.mrf.mxu0 }
  0xa4   :  { %v201_v19 = vpop.f32.mrf.mxu2 }
  0xa8   :  { %v174_v18 = vpop.f32.mrf.mxu1 }
  0xa9   :  { %v175_v20 = vadd.f32 %v174_v18, %v150_v17 }
  0xab   :  { %v204_v22 = vadd.f32 %v201_v19, %v175_v20 }
  0xad   :  { %v209_v23 = vadd.f32 %v244_v21, %v204_v22 }
  0xaf   :  { %v210_v24 = vmax.f32 %v209_v23, 0.0 }
  0xb1   :  { %211 = vst [vmem:[#allocation13] sm:$0xff] %v210_v24 }
  0xb2   :  { %222 = dma.vmem_to_hbm [thread:$0]  %s218_s30, 128, %s220_s10, [#allocation4]  }
  0xb3   :  { %421 = dma.done.wait [#allocation4], 128  }
  0xb4   :  { %422 = vsyncadd [#allocation4], 4294967168 }
  0xb5   :  { %227 = vsyncpa [#allocation3], 1 }
  0xb6   :  { %228 = vsyncpa [#allocation6], 1 }
  0xb7   :  { %229 = vsyncpa [#allocation9], 1 }
  0xb8   :  { %230 = vsyncpa [#allocation12], 1 }
  0xb9   :  { %231 = vsyncpa [#allocation4], 1 }

</bundles_post_ra>
